<compile_context>
chip_gen: v7x
topology: tpu7x:2x2x1
jax: 0.10.0
libtpu: 0.0.40
codegen_flags: <defaults>
</compile_context>

<pallas_src>
import functools

import jax
import jax.numpy as jnp
from jax.experimental import pallas as pl
from jax.experimental.pallas import tpu as pltpu


# Conservative cross-generation VMEM planning: estimated per-step usage is
# kept under _VMEM_BUDGET, and the compiler is given _VMEM_LIMIT of scoped
# VMEM (<= v7x's 64 MiB physical, well below v5e/v6e's 128 MiB).
_VMEM_BUDGET = 24 << 20
_VMEM_LIMIT = 48 << 20


def _mlp_kernel(x_ref, w1_ref, b1_ref, w2_ref, b2_ref, o_ref):
    """Fused Linear -> ReLU -> Linear on one (folded) row tile.

    x_ref : (TM, Kf)   folded input rows (x dtype, f32 or bf16)
    w1_ref: (Kf, Hf)   block-diagonal first weight (x dtype), resident
    b1_ref: (1, Hf)    tiled first bias (f32)
    w2_ref: (Hf, Of)   block-diagonal second weight (f32), MXU-stationary
    b2_ref: (1, Of)    tiled second bias (f32)
    o_ref : (TM, Of)   folded output rows (f32)
    """
    h = jnp.dot(x_ref[...], w1_ref[...], preferred_element_type=jnp.float32)
    h = jnp.maximum(h + b1_ref[...], 0.0)                      # (TM, Hf) f32
    y = jnp.dot(h, w2_ref[...], preferred_element_type=jnp.float32)
    o_ref[...] = (y + b2_ref[...]).astype(o_ref.dtype)


def _cdiv(a, b):
    return -(-a // b)


def _round_up(a, b):
    return _cdiv(a, b) * b


def _pick_fold(m, input_size):
    """Largest fold F with F*input_size == 128 and M % F == 0 (else 1)."""
    if 0 < input_size < 128 and 128 % input_size == 0:
        f = 128 // input_size            # power of two
        while f > 1 and m % f != 0:
            f //= 2
        return f
    return 1


def _plan_tiles(mf, kf, hf, of, x_itemsize, max_tile_f):
    """Pick (tile_rows, n_tiles) over the folded-row axis.

    Per-row VMEM cost uses *lane-padded* widths (VMEM pads the last dim to a
    multiple of 128) and accounts for: X block double-buffered, f32 h
    intermediate (x2 safety for the pre/post-ReLU temporaries), output block
    double-buffered, and the small y temporary.
    """
    pad = lambda n: _round_up(n, 128)
    per_row = (2 * pad(kf) * x_itemsize    # X block, double buffered
               + 2 * pad(hf) * 4           # f32 h intermediate(s)
               + 2 * pad(of) * 4           # output block, double buffered
               + pad(of) * 4)              # y temporary
    tile = min(mf, max(8, _VMEM_BUDGET // per_row))
    if max_tile_f is not None:
        tile = min(tile, max(1, max_tile_f))
    if tile >= mf:
        return mf, 1                       # single whole-array tile
    tile = max(8, (tile // 8) * 8)         # sublane multiple of 8
    ntiles = _cdiv(mf, tile)
    # v7x megacore: prefer an even number of grid steps when there is > 1.
    if ntiles > 1 and ntiles % 2 == 1:
        tile = max(8, _round_up(_cdiv(mf, ntiles + 1), 8))
        ntiles = _cdiv(mf, tile)
    return tile, ntiles


@functools.partial(jax.jit, static_argnames=("max_tile_rows",))
def dynamics_model_forward(x, w1, b1, w2, b2, *, max_tile_rows=None):
    """Pallas implementation of DynamicsModel.forward.

    Args (PyTorch-native parameter layouts):
      x  : [batch, n_objects, input_size]   (f32 or bf16; NOT cast here)
      w1 : [hidden, input_size]     b1 : [hidden]
      w2 : [2, hidden]              b2 : [2]
    Returns:
      [batch * n_objects, 2] float32
    """
    batch, n_objects, input_size = x.shape
    hidden = w1.shape[0]
    n_out = w2.shape[0]                     # == 2
    m = batch * n_objects

    # Fold F consecutive rows into the 128-lane axis (free reshape).
    fold = _pick_fold(m, input_size)
    mf = m // fold
    kf, hf, of = fold * input_size, fold * hidden, fold * n_out
    xf = x.reshape(mf, kf)                  # no dtype cast: keep HBM read minimal

    # Tiny block-diagonal folded weights / tiled biases (built once per trace).
    eye = jnp.eye(fold, dtype=jnp.float32)
    w1_bd = jnp.kron(eye, w1.T.astype(jnp.float32)).astype(x.dtype)   # (kf, hf)
    w2_bd = jnp.kron(eye, w2.T.astype(jnp.float32))                   # (hf, of)
    b1_f = jnp.tile(b1.astype(jnp.float32), fold).reshape(1, hf)
    b2_f = jnp.tile(b2.astype(jnp.float32), fold).reshape(1, of)

    max_tile_f = None if max_tile_rows is None else max(1, max_tile_rows // fold)
    tile_mf, ntiles = _plan_tiles(mf, kf, hf, of, x.dtype.itemsize, max_tile_f)
    rows_pad = ntiles * tile_mf             # padded output rows only; X is never padded

    cost = pl.CostEstimate(
        flops=2 * m * hidden * (input_size + n_out),
        transcendentals=0,
        bytes_accessed=int(m * input_size * x.dtype.itemsize
                           + kf * hf * x.dtype.itemsize
                           + (hf * of + hf + of) * 4
                           + m * n_out * 4),
    )

    out_f = pl.pallas_call(
        _mlp_kernel,
        out_shape=jax.ShapeDtypeStruct((rows_pad, of), jnp.float32),
        grid_spec=pltpu.PrefetchScalarGridSpec(
            num_scalar_prefetch=0,
            grid=(ntiles,),
            in_specs=[
                # Folded row tile of X; partial last block handled by the pipeline.
                pl.BlockSpec((tile_mf, kf), lambda i: (i, 0)),
                # Weights / biases: full arrays, resident across grid steps.
                pl.BlockSpec((kf, hf), lambda i: (0, 0)),
                pl.BlockSpec((1, hf), lambda i: (0, 0)),
                pl.BlockSpec((hf, of), lambda i: (0, 0)),
                pl.BlockSpec((1, of), lambda i: (0, 0)),
            ],
            out_specs=pl.BlockSpec((tile_mf, of), lambda i: (i, 0)),
        ),
        compiler_params=pltpu.CompilerParams(
            dimension_semantics=("parallel",),
            vmem_limit_bytes=_VMEM_LIMIT),
        cost_estimate=cost,
    )(xf, w1_bd, b1_f, w2_bd, b2_f)

    # Drop padded rows, unfold (mf, fold*2) -> (m, 2).  Tiny tensor.
    return out_f[:mf].reshape(m, n_out)


def _reference(x, w1, b1, w2, b2):
    x2d = x.reshape(-1, x.shape[-1]).astype(jnp.float32)
    h = jnp.maximum(x2d @ w1.T + b1, 0.0)
    return h @ w2.T + b2


if __name__ == "__main__":
    batch, n_objects = 2, 8
    input_size, hidden_size = 16, 32

    key = jax.random.PRNGKey(0)
    kx, k1, k2, k3, k4 = jax.random.split(key, 5)
    x = jax.random.normal(kx, (batch, n_objects, input_size), jnp.float32)
    # PyTorch Linear shapes: W1 [hidden, input], b1 [hidden], W2 [2, hidden], b2 [2]
    w1 = jax.random.normal(k1, (hidden_size, input_size), jnp.float32) * 0.1
    b1 = jax.random.normal(k2, (hidden_size,), jnp.float32) * 0.1
    w2 = jax.random.normal(k3, (2, hidden_size), jnp.float32) * 0.1
    b2 = jax.random.normal(k4, (2,), jnp.float32) * 0.1

    # 1) Small f32 path (fold=8, single whole-array tile): exact.
    ref = _reference(x, w1, b1, w2, b2)
    out = jax.block_until_ready(dynamics_model_forward(x, w1, b1, w2, b2))
    assert out.shape == (batch * n_objects, 2), out.shape
    assert jnp.allclose(out, ref, atol=1e-5, rtol=1e-5), "f32 mismatch"

    # 2) bf16 X stored upstream (no wrapper cast / extra HBM pass): loose tol.
    x_bf16 = x.astype(jnp.bfloat16)
    out_bf16 = jax.block_until_ready(
        dynamics_model_forward(x_bf16, w1, b1, w2, b2))
    assert jnp.allclose(out_bf16, ref, atol=3e-2, rtol=3e-2), "bf16 mismatch"

    # 3) Multi-tile + ragged + even-grid path: M = 2056 rows (fold=8 -> 257
    #    folded rows), max_tile_rows forces several grid steps and a partial
    #    last input block (no jnp.pad of X; padded output rows are sliced off).
    batch2, n_objects2 = 257, 8
    x_big = jax.random.normal(jax.random.fold_in(kx, 1),
                              (batch2, n_objects2, input_size), jnp.float32)
    ref_big = _reference(x_big, w1, b1, w2, b2)
    out_big = jax.block_until_ready(
        dynamics_model_forward(x_big, w1, b1, w2, b2, max_tile_rows=512))
    assert out_big.shape == (batch2 * n_objects2, 2), out_big.shape
    assert jnp.allclose(out_big, ref_big, atol=1e-4, rtol=1e-4), "tiled mismatch"

    # 4) Fold=1 fallback (input_size does not divide 128): still correct.
    input_size3 = 20
    kx3, k13, k33 = jax.random.split(jax.random.fold_in(key, 2), 3)
    x3 = jax.random.normal(kx3, (batch, n_objects, input_size3), jnp.float32)
    w1_3 = jax.random.normal(k13, (hidden_size, input_size3), jnp.float32) * 0.1
    w2_3 = jax.random.normal(k33, (2, hidden_size), jnp.float32) * 0.1
    ref3 = _reference(x3, w1_3, b1, w2_3, b2)
    out3 = jax.block_until_ready(dynamics_model_forward(x3, w1_3, b1, w2_3, b2))
    assert jnp.allclose(out3, ref3, atol=1e-5, rtol=1e-5), "fold=1 mismatch"

    print("KERNEL_OK")
</pallas_src>

<mosaic_0001>
module attributes {stable_mosaic.version = 11 : i64} {
  func.func @_mlp_kernel(%arg0: i32, %arg1: memref<2x128xf32, #tpu.memory_space<vmem>>, %arg2: memref<128x256xf32, #tpu.memory_space<vmem>>, %arg3: memref<1x256xf32, #tpu.memory_space<vmem>>, %arg4: memref<256x16xf32, #tpu.memory_space<vmem>>, %arg5: memref<1x16xf32, #tpu.memory_space<vmem>>, %arg6: memref<2x16xf32, #tpu.memory_space<vmem>>) attributes {dimension_semantics = [#tpu.dimension_semantics<parallel>], iteration_bounds = array<i64: 1>, scalar_prefetch = 0 : i64, scratch_operands = 0 : i64, tpu.core_type = #tpu.core_type<tc>, window_params = [{transform_indices = @transform_0, window_bounds = array<i64: 2, 128>}, {pipeline_mode = #tpu.pipeline_mode<synchronous>, transform_indices = @transform_1, window_bounds = array<i64: 128, 256>}, {pipeline_mode = #tpu.pipeline_mode<synchronous>, transform_indices = @transform_2, window_bounds = array<i64: 1, 256>}, {pipeline_mode = #tpu.pipeline_mode<synchronous>, transform_indices = @transform_3, window_bounds = array<i64: 256, 16>}, {pipeline_mode = #tpu.pipeline_mode<synchronous>, transform_indices = @transform_4, window_bounds = array<i64: 1, 16>}, {transform_indices = @transform_5, window_bounds = array<i64: 2, 16>}]} {
    %c0 = arith.constant 0 : index
    %c0_0 = arith.constant 0 : index
    %0 = vector.load %arg1[%c0, %c0_0] : memref<2x128xf32, #tpu.memory_space<vmem>>, vector<2x128xf32>
    %c0_1 = arith.constant 0 : index
    %c0_2 = arith.constant 0 : index
    %1 = vector.load %arg2[%c0_1, %c0_2] : memref<128x256xf32, #tpu.memory_space<vmem>>, vector<128x256xf32>
    %cst = arith.constant dense<0.000000e+00> : vector<2x256xf32>
    %2 = tpu.matmul %0, %1, %cst {dimension_numbers = #tpu.dot_dimension_numbers<[1], [0], [0], [1], [0, 0, 1, 1], [], []>} : vector<2x128xf32>, vector<128x256xf32>, vector<2x256xf32> -> vector<2x256xf32>
    %c0_3 = arith.constant 0 : index
    %c0_4 = arith.constant 0 : index
    %3 = vector.load %arg3[%c0_3, %c0_4] : memref<1x256xf32, #tpu.memory_space<vmem>>, vector<1x256xf32>
    %4 = vector.broadcast %3 : vector<1x256xf32> to vector<2x256xf32>
    %5 = arith.addf %2, %4 : vector<2x256xf32>
    %cst_5 = arith.constant 0.000000e+00 : f32
    %6 = vector.broadcast %cst_5 : f32 to vector<2x256xf32>
    %7 = arith.maximumf %5, %6 : vector<2x256xf32>
    %c0_6 = arith.constant 0 : index
    %c0_7 = arith.constant 0 : index
    %8 = vector.load %arg4[%c0_6, %c0_7] : memref<256x16xf32, #tpu.memory_space<vmem>>, vector<256x16xf32>
    %cst_8 = arith.constant dense<0.000000e+00> : vector<2x16xf32>
    %9 = tpu.matmul %7, %8, %cst_8 {dimension_numbers = #tpu.dot_dimension_numbers<[1], [0], [0], [1], [0, 0, 1, 1], [], []>} : vector<2x256xf32>, vector<256x16xf32>, vector<2x16xf32> -> vector<2x16xf32>
    %c0_9 = arith.constant 0 : index
    %c0_10 = arith.constant 0 : index
    %10 = vector.load %arg5[%c0_9, %c0_10] : memref<1x16xf32, #tpu.memory_space<vmem>>, vector<1x16xf32>
    %11 = vector.broadcast %10 : vector<1x16xf32> to vector<2x16xf32>
    %12 = arith.addf %9, %11 : vector<2x16xf32>
    %c0_11 = arith.constant 0 : index
    %c0_12 = arith.constant 0 : index
    %13 = vector.load %arg6[%c0_11, %c0_12] : memref<2x16xf32, #tpu.memory_space<vmem>>, vector<2x16xf32>
    tpu.vector_store %arg6[%c0_11, %c0_12], %12 {strides = array<i32>} : memref<2x16xf32, #tpu.memory_space<vmem>>, vector<2x16xf32>,
    return
  }
  func.func @transform_0(%arg0: i32) -> (i32, i32) {
    %c0_i32 = arith.constant 0 : i32
    %c0_i32_0 = arith.constant 0 : i32
    return %arg0, %c0_i32 : i32, i32
  }
  func.func @transform_1(%arg0: i32) -> (i32, i32) {
    %c0_i32 = arith.constant 0 : i32
    %c0_i32_0 = arith.constant 0 : i32
    %c0_i32_1 = arith.constant 0 : i32
    return %c0_i32, %c0_i32_0 : i32, i32
  }
  func.func @transform_2(%arg0: i32) -> (i32, i32) {
    %c0_i32 = arith.constant 0 : i32
    %c0_i32_0 = arith.constant 0 : i32
    %c0_i32_1 = arith.constant 0 : i32
    return %c0_i32, %c0_i32_0 : i32, i32
  }
  func.func @transform_3(%arg0: i32) -> (i32, i32) {
    %c0_i32 = arith.constant 0 : i32
    %c0_i32_0 = arith.constant 0 : i32
    %c0_i32_1 = arith.constant 0 : i32
    return %c0_i32, %c0_i32_0 : i32, i32
  }
  func.func @transform_4(%arg0: i32) -> (i32, i32) {
    %c0_i32 = arith.constant 0 : i32
    %c0_i32_0 = arith.constant 0 : i32
    %c0_i32_1 = arith.constant 0 : i32
    return %c0_i32, %c0_i32_0 : i32, i32
  }
  func.func @transform_5(%arg0: i32) -> (i32, i32) {
    %c0_i32 = arith.constant 0 : i32
    %c0_i32_0 = arith.constant 0 : i32
    return %arg0, %c0_i32 : i32, i32
  }
}

</mosaic_0001>

<bundles_post_ra>
// kernel: tile.13
= control target key start
LH: loop header
LB: loop body
LE: loop exit
PB: predicated region body
PF: predicated region fallthrough
CT: control target
= control target key end

     0   :  { %s22_s0 = inlined_call_operand.vmem [shape: f32[32], index: 0, kind: input, shape index: {}]   ;;  %s23_s1 = inlined_call_operand.vmem [shape: f32[8,32], index: 1, kind: output, shape index: {}]  }
   0x1   :  { %v4_v0 = vld [vmem:[%s22_s0] ss:$0 sm:$0xff] }
   0x2   :  { %5 = vst [vmem:[%s23_s1] sm:$0xff] %v4_v0 }

// kernel: tile.14
= control target key start
LH: loop header
LB: loop body
LE: loop exit
PB: predicated region body
PF: predicated region fallthrough
CT: control target
= control target key end

     0   :  { %s7_s6 = smov 3  ;;  %s14_s9 = smov 3  ;;  %vm4_vm0 = vcmask 261120   ;;  %vm11_vm1 = vcmask 1048320   ;;  %vm18_vm2 = vcmask 785920   ;;  %vm25_vm3 = vcmask 523520   ;;  %s76_s0 = inlined_call_operand.vmem [shape: f32[8,32], index: 0, kind: input, shape index: {}]   ;;  %s77_s1 = inlined_call_operand.vmem [shape: f32[1,256], index: 1, kind: output, shape index: {}]  }
   0x1   :  { %v38_v0 = vld [vmem:[%s76_s0 + $0x3] ss:$4 sm:%s7_s6]   ;;  %s45_s10 = smov 96   ;;  %s21_s11 = smov 3  ;;  %v39_v1 = vld [vmem:[%s76_s0 + $0x2] ss:$4 sm:%s14_s9]  }
   0x2   :  { %9 = vrot.lane.b32.xlu0 %v38_v0, %s45_s10  ;;  %v40_v2 = vld [vmem:[%s76_s0 + $0x1] ss:$4 sm:%s21_s11]   ;;  %s2_s16 = smov 3  ;;  %s46_s17 = smov 32  }
   0x3   :  { %23 = vrot.lane.b32.xlu1 %v40_v2, %s46_s17  ;;  %v3_v3 = vld [vmem:[%s76_s0] ss:$4 sm:%s2_s16]   ;;  %s47_s0 = smov 64  }
   0x4   :  { %5 = vst.msk [vmem:[#allocation0] ss:$8 sm:$0x3] %vm4_vm0, %v3_v3  }
   0x6   :  { %16 = vrot.lane.b32.xlu0 %v39_v1, %s47_s0 }
  0x74   :  { %v10_v4 = vpop.permute.xlu0 %9  }
  0x75   :  { %12 = vst.msk [vmem:[#allocation0] ss:$8 sm:$0x3] %vm11_vm1, %v10_v4   ;;  %v24_v5 = vpop.permute.xlu1 %23  }
  0x78   :  { %v17_v6 = vpop.permute.xlu0 %16  }
  0x79   :  { %19 = vst.msk [vmem:[#allocation0] ss:$8 sm:$0x3] %vm18_vm2, %v17_v6  }
  0x7a   :  { %26 = vst.msk [vmem:[#allocation0] ss:$8 sm:$0x3] %vm25_vm3, %v24_v5  }
  0x81   :  { %v30_v7 = vld [vmem:[#allocation0] sm:$0x1]  ;;  %v34_v8 = vld [vmem:[#allocation0 + $0x8] sm:$0x1] }
  0x82   :  { %32 = vst [vmem:[%s77_s1] sm:$0x1] %v30_v7  ;;  %41 = vst [vmem:[%s77_s1 + $0x1] sm:$0x1] %v34_v8 }

// kernel: tile.18
= control target key start
LH: loop header
LB: loop body
LE: loop exit
PB: predicated region body
PF: predicated region fallthrough
CT: control target
= control target key end

     0   :  { %s22_s0 = inlined_call_operand.vmem [shape: f32[2], index: 0, kind: input, shape index: {}]   ;;  %s23_s1 = inlined_call_operand.vmem [shape: f32[8,2], index: 1, kind: output, shape index: {}]  }
   0x1   :  { %v4_v0 = vld [vmem:[%s22_s0] ss:$0 sm:$0xff] }
   0x2   :  { %5 = vst [vmem:[%s23_s1] sm:$0xff] %v4_v0 }

// kernel: tile.19
= control target key start
LH: loop header
LB: loop body
LE: loop exit
PB: predicated region body
PF: predicated region fallthrough
CT: control target
= control target key end

     0   :  { %s67_s10 = smov 14   ;;  %s68_s11 = smov 10   ;;  %vm3_vm0 = vcmask 15360   ;;  %vm9_vm1 = vcmask 130160   ;;  %vm15_vm2 = vcmask 113760   ;;  %vm21_vm3 = vcmask 97360   ;;  %s111_s0 = inlined_call_operand.vmem [shape: f32[8,2], index: 0, kind: input, shape index: {}]   ;;  %s112_s1 = inlined_call_operand.vmem [shape: f32[1,16], index: 1, kind: output, shape index: {}]  }
   0x1   :  { %v53_v0 = vld [vmem:[%s111_s0 + $0x7] sm:$0x1]   ;;  %v55_v1 = vld [vmem:[%s111_s0 + $0x5] sm:$0x1]   ;;  %v54_v2 = vld [vmem:[%s111_s0 + $0x6] sm:$0x1]  }
   0x2   :  { %7 = vrot.lane.b32.xlu0 %v53_v0, %s67_s10  ;;  %19 = vrot.lane.b32.xlu1 %v55_v1, %s68_s11  ;;  %v56_v3 = vld [vmem:[%s111_s0 + $0x4] sm:$0x1]   ;;  %v2_v4 = vld [vmem:[%s111_s0] sm:$0x1]   ;;  %s69_s18 = smov 12   ;;  %s70_s19 = smov 8  }
   0x3   :  { %4 = vst.msk [vmem:[#allocation0] sm:$0x1] %vm3_vm0, %v2_v4   ;;  %v57_v5 = vld [vmem:[%s111_s0 + $0x3] sm:$0x1]   ;;  %v58_v6 = vld [vmem:[%s111_s0 + $0x2] sm:$0x1]  }
   0x4   :  { %s71_s24 = smov 6   ;;  %s72_s25 = smov 4   ;;  %v59_v7 = vld [vmem:[%s111_s0 + $0x1] sm:$0x1]   ;;  %vm27_vm4 = vcmask 80960   ;;  %vm33_vm5 = vcmask 64560  }
   0x5   :  { %s73_s0 = smov 2   ;;  %vm39_vm6 = vcmask 48160   ;;  %vm45_vm7 = vcmask 31760  }
   0x6   :  { %13 = vrot.lane.b32.xlu0 %v54_v2, %s69_s18  ;;  %25 = vrot.lane.b32.xlu1 %v56_v3, %s70_s19 }
   0xa   :  { %31 = vrot.lane.b32.xlu0 %v57_v5, %s71_s24  ;;  %37 = vrot.lane.b32.xlu1 %v58_v6, %s72_s25 }
   0xe   :  { %43 = vrot.lane.b32.xlu0 %v59_v7, %s73_s0 }
  0x74   :  { %v8_v8 = vpop.permute.xlu0 %7   ;;  %v20_v9 = vpop.permute.xlu1 %19  }
  0x75   :  { %10 = vst.msk [vmem:[#allocation0] sm:$0x1] %vm9_vm1, %v8_v8  }
  0x78   :  { %v14_v10 = vpop.permute.xlu0 %13   ;;  %v26_v11 = vpop.permute.xlu1 %25  }
  0x79   :  { %16 = vst.msk [vmem:[#allocation0] sm:$0x1] %vm15_vm2, %v14_v10  }
  0x7a   :  { %22 = vst.msk [vmem:[#allocation0] sm:$0x1] %vm21_vm3, %v20_v9  }
  0x7b   :  { %28 = vst.msk [vmem:[#allocation0] sm:$0x1] %vm27_vm4, %v26_v11  }
  0x7c   :  { %v32_v12 = vpop.permute.xlu0 %31   ;;  %v38_v13 = vpop.permute.xlu1 %37  }
  0x7d   :  { %34 = vst.msk [vmem:[#allocation0] sm:$0x1] %vm33_vm5, %v32_v12  }
  0x7e   :  { %40 = vst.msk [vmem:[#allocation0] sm:$0x1] %vm39_vm6, %v38_v13  }
  0x80   :  { %v44_v14 = vpop.permute.xlu0 %43  }
  0x81   :  { %46 = vst.msk [vmem:[#allocation0] sm:$0x1] %vm45_vm7, %v44_v14  }
  0x88   :  { %v50_v15 = vld [vmem:[#allocation0] sm:$0x1] }
  0x89   :  { %52 = vst [vmem:[%s112_s1] sm:$0x1] %v50_v15 }

// kernel: dynamics_model_forward.1
= control target key start
LH: loop header
LB: loop body
LE: loop exit
PB: predicated region body
PF: predicated region fallthrough
CT: control target
= control target key end

     0   :  { %v354_v3 = vmov 0.0   ;;  %vm247_vm0 = vcmask 123904   ;;  %s589_s1 = inlined_call_operand.vmem [shape: f32[128,256], index: 1, kind: input, shape index: {}]   ;;  %s590_s3 = inlined_call_operand.vmem [shape: f32[256,16], index: 3, kind: input, shape index: {}]   ;;  %s591_s0 = inlined_call_operand.vmem [shape: f32[2,128], index: 0, kind: input, shape index: {}]   ;;  %s592_s2 = inlined_call_operand.vmem [shape: f32[1,256], index: 2, kind: input, shape index: {}]   ;;  %s593_s4 = inlined_call_operand.vmem [shape: f32[1,16], index: 4, kind: input, shape index: {}]   ;;  %s594_s5 = inlined_call_operand.vmem [shape: f32[2,16], index: 5, kind: output, shape index: {}]  }
   0x1   :  { %v22_v0 = vld [vmem:[%s589_s1 + $0x8] sm:$0xff]  ;;  %v24_v1 = vld [vmem:[%s589_s1 + $0x18] sm:$0xff]  ;;  %v21_v2 = vld [vmem:[%s589_s1] sm:$0xff]  ;;  %129 = vmatprep.mubr.f32.mxu0 %v354_v3 }
   0x2   :  { %v289_v4 = vpack.c.bf16 %v24_v1, %v22_v0  ;;  %v23_v5 = vld [vmem:[%s589_s1 + $0x10] sm:$0xff]  ;;  %v26_v6 = vld [vmem:[%s589_s1 + $0x28] sm:$0xff]  ;;  %v28_v7 = vld [vmem:[%s589_s1 + $0x38] sm:$0xff] }
   0x3   :  { %v291_v8 = vpack.c.bf16 %v23_v5, %v21_v2  ;;  %v293_v9 = vpack.c.bf16 %v28_v7, %v26_v6  ;;  %v25_v10 = vld [vmem:[%s589_s1 + $0x20] sm:$0xff]  ;;  %v27_v11 = vld [vmem:[%s589_s1 + $0x30] sm:$0xff]  ;;  %v30_v12 = vld [vmem:[%s589_s1 + $0x48] sm:$0xff] }
   0x4   :  { %290 = vmatprep.subr.bf16.mxu0 %v289_v4  ;;  %v32_v13 = vld [vmem:[%s589_s1 + $0x58] sm:$0xff]  ;;  %v295_v14 = vpack.c.bf16 %v27_v11, %v25_v10  ;;  %v29_v16 = vld [vmem:[%s589_s1 + $0x40] sm:$0xff]  ;;  %v31_v17 = vld [vmem:[%s589_s1 + $0x50] sm:$0xff] }
   0x5   :  { %292 = vmatpush1.bf16.msra.mxu0 %v291_v8  ;;  %v297_v15 = vpack.c.bf16 %v32_v13, %v30_v12  ;;  %v34_v18 = vld [vmem:[%s589_s1 + $0x68] sm:$0xff]  ;;  %v36_v19 = vld [vmem:[%s589_s1 + $0x78] sm:$0xff]  ;;  %v299_v20 = vpack.c.bf16 %v31_v17, %v29_v16  ;;  %v33_v22 = vld [vmem:[%s589_s1 + $0x60] sm:$0xff] }
   0x6   :  { %294 = vmatprep.subr.bf16.mxu0 %v293_v9  ;;  %v301_v21 = vpack.c.bf16 %v36_v19, %v34_v18  ;;  %v35_v23 = vld [vmem:[%s589_s1 + $0x70] sm:$0xff]  ;;  %v38_v24 = vld [vmem:[%s589_s1 + $0x88] sm:$0xff]  ;;  %v40_v25 = vld [vmem:[%s589_s1 + $0x98] sm:$0xff] }
   0x7   :  { %v37_v26 = vld [vmem:[%s589_s1 + $0x80] sm:$0xff]  ;;  %v39_v27 = vld [vmem:[%s589_s1 + $0x90] sm:$0xff]  ;;  %v155_v29 = vld [vmem:[%s590_s3 + $0x88] sm:$0xff]  ;;  %v303_v31 = vpack.c.bf16 %v35_v23, %v33_v22  ;;  %v305_v36 = vpack.c.bf16 %v40_v25, %v38_v24 }
   0x8   :  { %v154_v28 = vld [vmem:[%s590_s3 + $0x80] sm:$0xff]  ;;  %v139_v33 = vld [vmem:[%s590_s3 + $0x8] sm:$0xff]  ;;  %v156_v34 = vld [vmem:[%s590_s3 + $0x90] sm:$0xff]  ;;  %v307_v46 = vpack.c.bf16 %v39_v27, %v37_v26 }
   0x9   :  { %296 = vmatpush1.bf16.msra.mxu0 %v295_v14  ;;  %v138_v30 = vld [vmem:[%s590_s3] sm:$0xff]  ;;  %v321_v32 = vpack.c.bf16 %v155_v29, %v154_v28  ;;  %v157_v35 = vld [vmem:[%s590_s3 + $0x98] sm:$0xff]  ;;  %v140_v39 = vld [vmem:[%s590_s3 + $0x10] sm:$0xff] }
   0xa   :  { %298 = vmatprep.subr.bf16.mxu0 %v297_v15  ;;  %v323_v37 = vpack.c.bf16 %v139_v33, %v138_v30  ;;  %v325_v38 = vpack.c.bf16 %v157_v35, %v156_v34  ;;  %v141_v40 = vld [vmem:[%s590_s3 + $0x18] sm:$0xff]  ;;  %v158_v41 = vld [vmem:[%s590_s3 + $0xa0] sm:$0xff]  ;;  %v42_v42 = vld [vmem:[%s589_s1 + $0xa8] sm:$0xff]  ;;  %v55_v34 = vlaneseq }
   0xb   :  { %v44_v43 = vld [vmem:[%s589_s1 + $0xb8] sm:$0xff]  ;;  %322 = vmatprep.subr.bf16.mxu1 %v321_v32  ;;  %v159_v44 = vld [vmem:[%s590_s3 + $0xa8] sm:$0xff]  ;;  %v327_v45 = vpack.c.bf16 %v141_v40, %v140_v39  ;;  %v41_v47 = vld [vmem:[%s589_s1 + $0xa0] sm:$0xff] }
   0xc   :  { %324 = vmatpush3.bf16.msra.mxu1 %v323_v37  ;;  %v329_v48 = vpack.c.bf16 %v159_v44, %v158_v41  ;;  %v142_v49 = vld [vmem:[%s590_s3 + $0x20] sm:$0xff]  ;;  %v143_v50 = vld [vmem:[%s590_s3 + $0x28] sm:$0xff]  ;;  %v309_v51 = vpack.c.bf16 %v44_v43, %v42_v42  ;;  %v43_v52 = vld [vmem:[%s589_s1 + $0xb0] sm:$0xff]  ;;  %v56_v35 = vshrl.u32 %v55_v34, 7 }
   0xd   :  { %300 = vmatpush1.bf16.msra.mxu0 %v299_v20  ;;  %326 = vmatprep.subr.bf16.mxu1 %v325_v38  ;;  %v160_v53 = vld [vmem:[%s590_s3 + $0xb0] sm:$0xff]  ;;  %v161_v54 = vld [vmem:[%s590_s3 + $0xb8] sm:$0xff]  ;;  %v46_v55 = vld [vmem:[%s589_s1 + $0xc8] sm:$0xff]  ;;  %v331_v57 = vpack.c.bf16 %v143_v50, %v142_v49  ;;  %v311_v58 = vpack.c.bf16 %v43_v52, %v41_v47 }
   0xe   :  { %302 = vmatprep.subr.bf16.mxu0 %v301_v21  ;;  %v48_v56 = vld [vmem:[%s589_s1 + $0xd8] sm:$0xff]  ;;  %v45_v59 = vld [vmem:[%s589_s1 + $0xc0] sm:$0xff]  ;;  %v333_v60 = vpack.c.bf16 %v161_v54, %v160_v53  ;;  %v144_v61 = vld [vmem:[%s590_s3 + $0x30] sm:$0xff]  ;;  %v61_v38 = vsub.s32 1, %v56_v35 }
   0xf   :  { %v145_v62 = vld [vmem:[%s590_s3 + $0x38] sm:$0xff]  ;;  %v313_v63 = vpack.c.bf16 %v48_v56, %v46_v55  ;;  %v47_v0 = vld [vmem:[%s589_s1 + $0xd0] sm:$0xff]  ;;  %v162_v1 = vld [vmem:[%s590_s3 + $0xc0] sm:$0xff] }
  0x10   :  { %328 = vmatpush3.bf16.msra.mxu1 %v327_v45  ;;  %v163_v2 = vld [vmem:[%s590_s3 + $0xc8] sm:$0xff]  ;;  %v52_v4 = vld [vmem:[%s589_s1 + $0xf8] sm:$0xff]  ;;  %v335_v5 = vpack.c.bf16 %v145_v62, %v144_v61  ;;  %v315_v6 = vpack.c.bf16 %v47_v0, %v45_v59  ;;  %v49_v7 = vld [vmem:[%s589_s1 + $0xe0] sm:$0xff] }
  0x11   :  { %304 = vmatpush1.bf16.msra.mxu0 %v303_v31  ;;  %330 = vmatprep.subr.bf16.mxu1 %v329_v48  ;;  %v50_v3 = vld [vmem:[%s589_s1 + $0xe8] sm:$0xff]  ;;  %v337_v8 = vpack.c.bf16 %v163_v2, %v162_v1  ;;  %v146_v9 = vld [vmem:[%s590_s3 + $0x40] sm:$0xff]  ;;  %v51_v12 = vld [vmem:[%s589_s1 + $0xf0] sm:$0xff] }
  0x12   :  { %306 = vmatprep.subr.bf16.mxu0 %v305_v36  ;;  %v147_v10 = vld [vmem:[%s590_s3 + $0x48] sm:$0xff]  ;;  %v317_v11 = vpack.c.bf16 %v52_v4, %v50_v3  ;;  %v164_v13 = vld [vmem:[%s590_s3 + $0xd0] sm:$0xff]  ;;  %v165_v14 = vld [vmem:[%s590_s3 + $0xd8] sm:$0xff]  ;;  %v319_v16 = vpack.c.bf16 %v51_v12, %v49_v7  ;;  %v57_v36 = vsub.s32 0, %v56_v35 }
  0x13   :  { %v339_v15 = vpack.c.bf16 %v147_v10, %v146_v9  ;;  %v341_v17 = vpack.c.bf16 %v165_v14, %v164_v13  ;;  %v148_v18 = vld [vmem:[%s590_s3 + $0x50] sm:$0xff]  ;;  %v149_v19 = vld [vmem:[%s590_s3 + $0x58] sm:$0xff]  ;;  %v166_v20 = vld [vmem:[%s590_s3 + $0xe0] sm:$0xff] }
  0x14   :  { %332 = vmatpush3.bf16.msra.mxu1 %v331_v57  ;;  %v167_v21 = vld [vmem:[%s590_s3 + $0xe8] sm:$0xff]  ;;  %v343_v22 = vpack.c.bf16 %v149_v19, %v148_v18  ;;  %v20_v23 = vld [vmem:[%s591_s0] sm:$0x3]  ;;  %v168_v28 = vld [vmem:[%s590_s3 + $0xf0] sm:$0xff] }
  0x15   :  { %308 = vmatpush1.bf16.msra.mxu0 %v307_v46  ;;  %334 = vmatprep.subr.bf16.mxu1 %v333_v60  ;;  %v345_v24 = vpack.c.bf16 %v167_v21, %v166_v20  ;;  %v150_v25 = vld [vmem:[%s590_s3 + $0x60] sm:$0xff]  ;;  %v151_v26 = vld [vmem:[%s590_s3 + $0x68] sm:$0xff]  ;;  %v169_v29 = vld [vmem:[%s590_s3 + $0xf8] sm:$0xff] }
  0x16   :  { %310 = vmatprep.subr.bf16.mxu0 %v309_v51  ;;  %v347_v27 = vpack.c.bf16 %v151_v26, %v150_v25  ;;  %v349_v30 = vpack.c.bf16 %v169_v29, %v168_v28  ;;  %v152_v31 = vld [vmem:[%s590_s3 + $0x70] sm:$0xff]  ;;  %v153_v32 = vld [vmem:[%s590_s3 + $0x78] sm:$0xff]  ;;  %v53_v37 = vld [vmem:[%s592_s2] sm:$0x3] }
  0x17   :  { %v351_v33 = vpack.c.bf16 %v153_v32, %v152_v31  ;;  %v58_v39 = vrot.slane %v53_v37, %v57_v36  ;;  %v62_v40 = vrot.slane %v53_v37, %v61_v38  ;;  %v253_v48 = vld [vmem:[%s593_s4] ss:$0 sm:$0xff] }
  0x18   :  { %336 = vmatpush3.bf16.msra.mxu1 %v335_v5 }
  0x19   :  { %312 = vmatpush1.bf16.msra.mxu0 %v311_v58  ;;  %338 = vmatprep.subr.bf16.mxu1 %v337_v8 }
  0x1a   :  { %314 = vmatprep.subr.bf16.mxu0 %v313_v63 }
  0x1c   :  { %340 = vmatpush3.bf16.msra.mxu1 %v339_v15 }
  0x1d   :  { %316 = vmatpush1.bf16.msra.mxu0 %v315_v6  ;;  %342 = vmatprep.subr.bf16.mxu1 %v341_v17 }
  0x1e   :  { %318 = vmatprep.subr.bf16.mxu0 %v317_v11 }
  0x20   :  { %344 = vmatpush3.bf16.msra.mxu1 %v343_v22 }
  0x21   :  { %320 = vmatpush1.bf16.msra.mxu0 %v319_v16  ;;  %346 = vmatprep.subr.bf16.mxu1 %v345_v24 }
  0x24   :  { %130 = vmatmul.mubr.f32.vlgmr.msra.gmra.mrb[0].mxu0 %v20_v23  ;;  %348 = vmatpush3.bf16.msra.mxu1 %v347_v27 }
  0x25   :  { %350 = vmatprep.subr.bf16.mxu1 %v349_v30 }
  0x28   :  { %352 = vmatpush3.bf16.msra.mxu1 %v351_v33 }
  0xf7   :  { %v131_v41 = vpop.f32.mrb[0].mxu0 }
  0xf8   :  { %v132_v42 = vadd.f32 %v131_v41, %v58_v39  ;;  %v133_v43 = vpop.f32.mrb[1].mxu0 }
  0xf9   :  { %v134_v44 = vadd.f32 %v133_v43, %v62_v40 }
  0xfa   :  { %v136_v46 = vmax.f32 %v132_v42, 0.0 }
  0xfb   :  { %v137_v45 = vmax.f32 %v134_v44, 0.0 }
  0xfd   :  { %241 = vmatprep.mubr.f32.mxu1 %v137_v45 }
  0xfe   :  { %242 = vmatmul.mubr.f32.vlgmr.msra.gmra.mrb[0].mxu1 %v136_v46 }
 0x1d1   :  { %v286_v47 = vpop.f32.mrb[0].mxu1 }
 0x1d2   :  { %v287_v49 = vpop.f32.mrb[1].mxu1 }
 0x1d3   :  { %v288_v50 = vadd.f32 %v287_v49, %v286_v47 }
 0x1d5   :  { %v244_v51 = vadd.f32 %v288_v50, %v253_v48 }
 0x1d7   :  { %248 = vst.msk [vmem:[%s594_s5] sm:$0x3] %vm247_vm0, %v244_v51 }

</bundles_post_ra>
